<compile_context>
chip_gen: v7x
topology: tpu7x:2x2x1
jax: 0.10.0
libtpu: 0.0.40
codegen_flags: <defaults>
</compile_context>

<pallas_src>
import jax
import jax.numpy as jnp
from jax.experimental import pallas as pl
from jax.experimental.pallas import tpu as pltpu

_LANE = 128


def _round_up(x, m):
    return ((x + m - 1) // m) * m


def _cdiv(a, b):
    return -(-a // b)


def _vmem_limit_bytes():
    """Scoped-VMEM limit with headroom; v5e/v6e have 128 MiB physical, v7x only 64 MiB."""
    try:
        cap = int(pltpu.get_tpu_info().vmem_capacity_bytes)
    except Exception:                      # older jax / non-TPU tracing -> assume v7x (smallest)
        cap = 64 * 1024 * 1024
    return min(max(cap - 16 * 1024 * 1024, 32 * 1024 * 1024), 96 * 1024 * 1024)


def _make_focal_kernel(emit_rows, has_alpha_vec, alpha_scalar, gamma, ignore_index):
    """Builds a kernel specialized on (output kind, alpha kind, gamma, ignore_index)."""

    def kernel(*refs):
        if has_alpha_vec:
            alpha_ref, logits_ref, tgt_ref, out_ref = refs
        else:
            alpha_ref = None
            logits_ref, tgt_ref, out_ref = refs

        x = logits_ref[...].astype(jnp.float32)          # (C, T): classes on sublanes
        tgt = tgt_ref[...].astype(jnp.int32)             # (1, T)
        c, t = x.shape

        # Stable softmax pieces over the class (sublane/XLU) axis.  The target logit and
        # target prob are gathered with selects (no bool->f32 casts, no second exp):
        #   log_pt = shifted[tgt] - log(sum_exp),   pt = exp(shifted)[tgt] / sum_exp
        m = jnp.max(x, axis=0, keepdims=True)                                # (1, T)
        shifted = x - m                                                      # (C, T)
        e = jnp.exp(shifted)                                                 # (C, T)
        sum_e = jnp.sum(e, axis=0, keepdims=True)                            # (1, T)
        lse = jnp.log(sum_e)                                                 # (1, T)

        onehot = jax.lax.broadcasted_iota(jnp.int32, (c, t), 0) == tgt       # (C, T) bool
        log_pt = jnp.sum(jnp.where(onehot, shifted, 0.0), axis=0, keepdims=True) - lse
        pt = jnp.sum(jnp.where(onehot, e, 0.0), axis=0, keepdims=True) / sum_e

        if alpha_ref is not None:
            # per-class alpha: (C, 1) column broadcast across lanes, gathered via onehot
            at = jnp.sum(jnp.where(onehot, alpha_ref[...], 0.0), axis=0, keepdims=True)
        else:
            at = alpha_scalar                                                # python const

        one_minus_pt = 1.0 - pt
        ig = int(gamma)
        if gamma == ig and 0 <= ig <= 8:
            # integer-gamma fast path: unrolled VPU multiplies (gamma=2 -> one square)
            if ig == 0:
                focal = jnp.ones_like(pt)
            else:
                focal = one_minus_pt
                for _ in range(ig - 1):
                    focal = focal * one_minus_pt
        else:
            focal = jnp.power(one_minus_pt, gamma)       # non-integer gamma fallback

        # ignore_index samples contribute exactly 0.  The padded target tail is
        # ignore_index too, so garbage in the unread (ragged) logits tail is masked here.
        valid = tgt != ignore_index                                          # (1, T) bool
        loss = jnp.where(valid, -at * focal * log_pt, 0.0)                   # (1, T)

        if emit_rows:
            out_ref[...] = loss.astype(out_ref.dtype)    # lane-dense (1, T) store
        else:
            s = jnp.sum(loss)
            cnt = jnp.sum(valid.astype(jnp.float32))
            lane = jax.lax.broadcasted_iota(jnp.int32, out_ref.shape, 2)     # (1, 8, 128)
            # per-tile partial block: lane 0 = loss sum of this tile, lane 1 = valid count
            out_ref[...] = jnp.where(lane == 0, s, jnp.where(lane == 1, cnt, 0.0))

    return kernel


def focal_loss(logits, targets, alpha=1.0, gamma=2.0, ignore_index=-100,
               reduction="mean", tile_cols=131072, class_first=False, none_out_dtype=None):
    """JAX/Pallas equivalent of retinababyface FocalLoss.forward.

    class_first=False: logits (..., C), targets (...)                       [PyTorch layout]
    class_first=True : logits (C, ...), targets (...)  -- preferred contract: the
        classification head can emit this layout directly, so the big activation is never
        transposed or copied before the kernel.
    """
    if class_first:
        c = int(logits.shape[0])
        out_shape_nd = logits.shape[1:]
        logits_cn = logits.reshape(c, -1)            # contiguous reshape: no copy
    else:
        c = int(logits.shape[-1])
        out_shape_nd = logits.shape[:-1]
        # TODO(synk): this transpose materializes a (C, N) copy of the logits in HBM.
        # Produce class-leading logits upstream (class_first=True) to avoid it entirely.
        logits_cn = jnp.swapaxes(logits.reshape(-1, c), 0, 1)
    n = int(logits_cn.shape[1])

    # ---- column-tile sizing: lane-dense tiles, as large as the per-chip VMEM allows ----
    vmem_limit = _vmem_limit_bytes()
    vmem_budget = (vmem_limit * 2) // 3
    in_bytes = jnp.dtype(logits.dtype).itemsize
    c_sub = _round_up(c, 8)
    use_i16 = (-(2 ** 15) <= int(ignore_index) < 2 ** 15) and c <= 2 ** 15
    tgt_bytes = 2 if use_i16 else 4
    # per-column VMEM: double-buffered logits + targets + row-output, plus ~7 f32
    # (C-sublane) intermediate slabs the kernel may materialize.
    bytes_per_col = (2 * c_sub * in_bytes) + (2 * 8 * tgt_bytes) + (7 * c_sub * 4) + (2 * 8 * 4)

    n_cols = max(_LANE, _round_up(n, _LANE))
    tile_max = max(512, (vmem_budget // bytes_per_col) // _LANE * _LANE)
    tile_max = max(_LANE, min(tile_max, int(tile_cols), n_cols))

    num_tiles = _cdiv(n_cols, tile_max)
    if num_tiles > 1:
        # balance tile sizes and prefer an even tile count so the "parallel" grid axis
        # load-balances across v7x's two TensorCores (no tiny ragged last tile).
        cand = num_tiles + (num_tiles & 1)
        tile = _round_up(_cdiv(n_cols, cand), _LANE)
        if (cand - 1) * tile < n_cols:
            num_tiles = cand
        else:
            tile = _round_up(_cdiv(n_cols, num_tiles), _LANE)
    else:
        tile = n_cols
    n_pad = num_tiles * tile

    # Only the tiny target vector is padded (with ignore_index) so the ragged logits tail
    # contributes exactly 0; the big logits array is consumed as-is (no pad, no copy).
    tgt_dtype = jnp.int16 if use_i16 else jnp.int32
    tgt_row = jnp.pad(targets.reshape(-1).astype(tgt_dtype), (0, n_pad - n),
                      constant_values=ignore_index).reshape(1, n_pad)

    if isinstance(alpha, (list, tuple)):
        alpha_vals = [float(a) for a in alpha]
        assert len(alpha_vals) == c, "per-class alpha must have length C"
        has_alpha_vec = True
        alpha_args = (jnp.asarray(alpha_vals, jnp.float32).reshape(c, 1),)
        alpha_specs = [pl.BlockSpec((c, 1), lambda i: (0, 0))]
        alpha_scalar = 1.0
    else:
        has_alpha_vec = False
        alpha_args = ()
        alpha_specs = []
        alpha_scalar = float(alpha)

    emit_rows = reduction == "none"
    kernel = _make_focal_kernel(emit_rows, has_alpha_vec, alpha_scalar,
                                float(gamma), int(ignore_index))

    in_specs = alpha_specs + [
        pl.BlockSpec((c, tile), lambda i: (0, i)),   # logits tile, classes on sublanes
        pl.BlockSpec((1, tile), lambda i: (0, i)),   # targets tile, lane-dense
    ]
    if emit_rows:
        out_dtype = jnp.dtype(none_out_dtype) if none_out_dtype is not None else logits.dtype
        out_shape = jax.ShapeDtypeStruct((1, n), out_dtype)
        out_specs = pl.BlockSpec((1, tile), lambda i: (0, i))
    else:
        out_shape = jax.ShapeDtypeStruct((num_tiles, 8, 128), jnp.float32)
        out_specs = pl.BlockSpec((1, 8, 128), lambda i: (i, 0, 0))

    out = pl.pallas_call(
        kernel,
        out_shape=out_shape,
        grid_spec=pltpu.PrefetchScalarGridSpec(
            num_scalar_prefetch=0,
            grid=(num_tiles,),
            in_specs=in_specs,
            out_specs=out_specs,
        ),
        compiler_params=pltpu.CompilerParams(
            # disjoint per-tile outputs -> grid axis can be sharded across both v7x TCs
            dimension_semantics=("parallel",),
            vmem_limit_bytes=int(vmem_limit),
        ),
    )(*alpha_args, logits_cn, tgt_row)

    if emit_rows:
        return out[0].reshape(out_shape_nd)          # metadata-only reshape, no copy

    total = jnp.sum(out[:, 0, 0])
    count = jnp.sum(out[:, 0, 1])
    if reduction == "sum":
        return total
    # 'mean': PyTorch returns 0.0 when there are no valid (non-ignored) samples.
    return jnp.where(count > 0, total / jnp.maximum(count, 1.0), jnp.float32(0.0))


def _reference_focal_loss(logits, targets, alpha, gamma, ignore_index, reduction):
    """Pure-JAX reference mirroring the PyTorch FocalLoss.forward."""
    orig_shape = logits.shape
    c = orig_shape[-1]
    l2 = logits.reshape(-1, c).astype(jnp.float32)
    t1 = targets.reshape(-1)
    valid = t1 != ignore_index
    tc = jnp.clip(t1, 0, c - 1)
    log_probs = jax.nn.log_softmax(l2, axis=-1)
    log_pt = jnp.take_along_axis(log_probs, tc[:, None], axis=1)[:, 0]
    pt = jnp.exp(log_pt)
    if isinstance(alpha, (list, tuple)):
        at = jnp.asarray(alpha, jnp.float32)[tc]
    else:
        at = jnp.float32(alpha)
    loss = -at * (1.0 - pt) ** gamma * log_pt
    loss = jnp.where(valid, loss, 0.0)
    if reduction == "mean":
        cnt = jnp.sum(valid.astype(jnp.float32))
        return jnp.where(cnt > 0, jnp.sum(loss) / jnp.maximum(cnt, 1.0), jnp.float32(0.0))
    if reduction == "sum":
        return jnp.sum(loss)
    return loss.reshape(orig_shape[:-1])


if __name__ == "__main__":
    key = jax.random.PRNGKey(0)
    k1, k2 = jax.random.split(key)

    # RetinaFace-like classification head: batch=2, 16 anchors, 6 classes (5 = background).
    B, N, C = 2, 16, 6
    logits = jax.random.normal(k1, (B, N, C), dtype=jnp.float32)
    targets = jax.random.randint(k2, (B, N), 0, C, dtype=jnp.int32)
    targets = targets.at[0, 0].set(-100)   # some ignored anchors
    targets = targets.at[1, 5].set(-100)

    alpha = [0.25, 0.25, 0.25, 0.25, 0.25, 1.0]
    gamma = 2.0

    # 1) mean reduction, per-class alpha (the MultiTaskLoss configuration).
    out_mean = jax.block_until_ready(
        focal_loss(logits, targets, alpha=alpha, gamma=gamma, reduction="mean"))
    ref_mean = _reference_focal_loss(logits, targets, alpha, gamma, -100, "mean")
    assert jnp.allclose(out_mean, ref_mean, rtol=1e-5, atol=1e-6), (out_mean, ref_mean)

    # 2) class-leading (C, ...) logits: the preferred, copy-free input contract.
    logits_cf = jnp.moveaxis(logits, -1, 0)          # (C, B, N)
    out_cf = jax.block_until_ready(
        focal_loss(logits_cf, targets, alpha=alpha, gamma=gamma,
                   reduction="mean", class_first=True))
    assert jnp.allclose(out_cf, ref_mean, rtol=1e-5, atol=1e-6), (out_cf, ref_mean)

    # 3) 'none' reduction: per-anchor loss, zeros at ignored positions, lane-dense output.
    out_none = jax.block_until_ready(
        focal_loss(logits, targets, alpha=alpha, gamma=gamma, reduction="none"))
    ref_none = _reference_focal_loss(logits, targets, alpha, gamma, -100, "none")
    assert out_none.shape == (B, N)
    assert jnp.allclose(out_none, ref_none, rtol=1e-5, atol=1e-6)

    # 4) 'sum' reduction with scalar alpha (exercises the alpha-free kernel variant).
    out_sum = jax.block_until_ready(
        focal_loss(logits, targets, alpha=0.5, gamma=gamma, reduction="sum"))
    ref_sum = _reference_focal_loss(logits, targets, 0.5, gamma, -100, "sum")
    assert jnp.allclose(out_sum, ref_sum, rtol=1e-5, atol=1e-6)

    # 5) bf16 logits pass straight through (no wrapper cast; kernel upcasts per tile).
    logits_bf16 = logits.astype(jnp.bfloat16)
    out_bf16 = jax.block_until_ready(
        focal_loss(logits_bf16, targets, alpha=alpha, gamma=gamma, reduction="mean"))
    ref_bf16 = _reference_focal_loss(logits_bf16, targets, alpha, gamma, -100, "mean")
    assert jnp.allclose(out_bf16, ref_bf16, rtol=1e-4, atol=1e-5)

    # 6) all anchors ignored -> PyTorch returns 0.0 for 'mean'.
    targets_ign = jnp.full((B, N), -100, dtype=jnp.int32)
    out_ign = jax.block_until_ready(
        focal_loss(logits, targets_ign, alpha=alpha, gamma=gamma, reduction="mean"))
    assert jnp.allclose(out_ign, 0.0)

    print("KERNEL_OK")
</pallas_src>

<mosaic_0001>
module attributes {stable_mosaic.version = 11 : i64} {
  func.func @kernel(%arg0: i32, %arg1: memref<6x1xf32, #tpu.memory_space<vmem>>, %arg2: memref<6x128xf32, #tpu.memory_space<vmem>>, %arg3: memref<1x128xi16, #tpu.memory_space<vmem>>, %arg4: memref<1x8x128xf32, #tpu.memory_space<vmem>>) attributes {dimension_semantics = [#tpu.dimension_semantics<parallel>], iteration_bounds = array<i64: 1>, scalar_prefetch = 0 : i64, scratch_operands = 0 : i64, tpu.core_type = #tpu.core_type<tc>, window_params = [{pipeline_mode = #tpu.pipeline_mode<synchronous>, transform_indices = @transform_0, window_bounds = array<i64: 6, 1>}, {transform_indices = @transform_1, window_bounds = array<i64: 6, 128>}, {transform_indices = @transform_2, window_bounds = array<i64: 1, 128>}, {transform_indices = @transform_3, window_bounds = array<i64: 1, 8, 128>}]} {
    %c0 = arith.constant 0 : index
    %c0_0 = arith.constant 0 : index
    %0 = vector.load %arg2[%c0, %c0_0] : memref<6x128xf32, #tpu.memory_space<vmem>>, vector<6x128xf32>
    %c0_1 = arith.constant 0 : index
    %c0_2 = arith.constant 0 : index
    %1 = vector.load %arg3[%c0_1, %c0_2] : memref<1x128xi16, #tpu.memory_space<vmem>>, vector<1x128xi16>
    %2 = arith.extsi %1 : vector<1x128xi16> to vector<1x128xi32>
    %cst = arith.constant dense<0xFF800000> : vector<128xf32>
    %3 = vector.multi_reduction <maximumf>, %0, %cst [0] : vector<6x128xf32> to vector<128xf32>
    %4 = vector.shape_cast %3 : vector<128xf32> to vector<1x128xf32>
    %5 = vector.broadcast %4 : vector<1x128xf32> to vector<6x128xf32>
    %6 = arith.subf %0, %5 : vector<6x128xf32>
    %7 = math.exp %6 : vector<6x128xf32>
    %cst_3 = arith.constant dense<0.000000e+00> : vector<128xf32>
    %8 = vector.multi_reduction <add>, %7, %cst_3 [0] : vector<6x128xf32> to vector<128xf32>
    %9 = vector.shape_cast %8 : vector<128xf32> to vector<1x128xf32>
    %10 = math.log %9 : vector<1x128xf32>
    %11 = tpu.iota {dimensions = array<i32: 0>} : vector<6x128xi32>
    %12 = vector.broadcast %2 : vector<1x128xi32> to vector<6x128xi32>
    %13 = arith.cmpi eq, %11, %12 : vector<6x128xi32>
    %cst_4 = arith.constant 0.000000e+00 : f32
    %14 = vector.broadcast %cst_4 : f32 to vector<6x128xf32>
    %15 = arith.select %13, %6, %14 : vector<6x128xi1>, vector<6x128xf32>
    %cst_5 = arith.constant dense<0.000000e+00> : vector<128xf32>
    %16 = vector.multi_reduction <add>, %15, %cst_5 [0] : vector<6x128xf32> to vector<128xf32>
    %17 = vector.shape_cast %16 : vector<128xf32> to vector<1x128xf32>
    %18 = arith.subf %17, %10 : vector<1x128xf32>
    %cst_6 = arith.constant 0.000000e+00 : f32
    %19 = vector.broadcast %cst_6 : f32 to vector<6x128xf32>
    %20 = arith.select %13, %7, %19 : vector<6x128xi1>, vector<6x128xf32>
    %cst_7 = arith.constant dense<0.000000e+00> : vector<128xf32>
    %21 = vector.multi_reduction <add>, %20, %cst_7 [0] : vector<6x128xf32> to vector<128xf32>
    %22 = vector.shape_cast %21 : vector<128xf32> to vector<1x128xf32>
    %23 = arith.divf %22, %9 : vector<1x128xf32>
    %c0_8 = arith.constant 0 : index
    %c0_9 = arith.constant 0 : index
    %24 = vector.load %arg1[%c0_8, %c0_9] : memref<6x1xf32, #tpu.memory_space<vmem>>, vector<6x1xf32>
    %cst_10 = arith.constant 0.000000e+00 : f32
    %25 = vector.shape_cast %24 : vector<6x1xf32> to vector<6x1xf32>
    %26 = vector.broadcast %25 : vector<6x1xf32> to vector<6x128xf32>
    %27 = vector.broadcast %cst_10 : f32 to vector<6x128xf32>
    %28 = arith.select %13, %26, %27 : vector<6x128xi1>, vector<6x128xf32>
    %cst_11 = arith.constant dense<0.000000e+00> : vector<128xf32>
    %29 = vector.multi_reduction <add>, %28, %cst_11 [0] : vector<6x128xf32> to vector<128xf32>
    %30 = vector.shape_cast %29 : vector<128xf32> to vector<1x128xf32>
    %cst_12 = arith.constant 1.000000e+00 : f32
    %31 = vector.broadcast %cst_12 : f32 to vector<1x128xf32>
    %32 = arith.subf %31, %23 : vector<1x128xf32>
    %33 = arith.mulf %32, %32 : vector<1x128xf32>
    %c-100_i32 = arith.constant -100 : i32
    %34 = vector.broadcast %c-100_i32 : i32 to vector<1x128xi32>
    %35 = arith.cmpi ne, %2, %34 : vector<1x128xi32>
    %cst_13 = arith.constant 0.000000e+00 : f32
    %36 = vector.broadcast %cst_13 : f32 to vector<1x128xf32>
    %37 = arith.subf %36, %30 : vector<1x128xf32>
    %38 = arith.mulf %37, %33 : vector<1x128xf32>
    %39 = arith.mulf %38, %18 : vector<1x128xf32>
    %cst_14 = arith.constant 0.000000e+00 : f32
    %40 = vector.broadcast %cst_14 : f32 to vector<1x128xf32>
    %41 = arith.select %35, %39, %40 : vector<1x128xi1>, vector<1x128xf32>
    %42 = vector.shape_cast %41 : vector<1x128xf32> to vector<1x1x128xf32>
    %cst_15 = arith.constant dense<0.000000e+00> : vector<1xf32>
    %43 = vector.multi_reduction <add>, %42, %cst_15 [1, 2] : vector<1x1x128xf32> to vector<1xf32>
    %44 = vector.shape_cast %43 : vector<1xf32> to vector<1x1x1xf32>
    %45 = vector.extract %44[0, 0, 0] : f32 from vector<1x1x1xf32>
    %46 = arith.extui %35 : vector<1x128xi1> to vector<1x128xi32>
    %47 = arith.sitofp %46 : vector<1x128xi32> to vector<1x128xf32>
    %48 = vector.shape_cast %47 : vector<1x128xf32> to vector<1x1x128xf32>
    %cst_16 = arith.constant dense<0.000000e+00> : vector<1xf32>
    %49 = vector.multi_reduction <add>, %48, %cst_16 [1, 2] : vector<1x1x128xf32> to vector<1xf32>
    %50 = vector.shape_cast %49 : vector<1xf32> to vector<1x1x1xf32>
    %51 = vector.extract %50[0, 0, 0] : f32 from vector<1x1x1xf32>
    %52 = tpu.iota {dimensions = array<i32: 2>} : vector<1x8x128xi32>
    %c0_i32 = arith.constant 0 : i32
    %53 = vector.broadcast %c0_i32 : i32 to vector<1x8x128xi32>
    %54 = arith.cmpi eq, %52, %53 : vector<1x8x128xi32>
    %c1_i32 = arith.constant 1 : i32
    %55 = vector.broadcast %c1_i32 : i32 to vector<1x8x128xi32>
    %56 = arith.cmpi eq, %52, %55 : vector<1x8x128xi32>
    %cst_17 = arith.constant 0.000000e+00 : f32
    %57 = vector.broadcast %51 : f32 to vector<1x8x128xf32>
    %58 = vector.broadcast %cst_17 : f32 to vector<1x8x128xf32>
    %59 = arith.select %56, %57, %58 : vector<1x8x128xi1>, vector<1x8x128xf32>
    %60 = vector.broadcast %45 : f32 to vector<1x8x128xf32>
    %61 = arith.select %54, %60, %59 : vector<1x8x128xi1>, vector<1x8x128xf32>
    %c0_18 = arith.constant 0 : index
    %c0_19 = arith.constant 0 : index
    %c0_20 = arith.constant 0 : index
    %62 = vector.load %arg4[%c0_18, %c0_19, %c0_20] : memref<1x8x128xf32, #tpu.memory_space<vmem>>, vector<1x8x128xf32>
    tpu.vector_store %arg4[%c0_18, %c0_19, %c0_20], %61 {strides = array<i32>} : memref<1x8x128xf32, #tpu.memory_space<vmem>>, vector<1x8x128xf32>,
    return
  }
  func.func @transform_0(%arg0: i32) -> (i32, i32) {
    %c0_i32 = arith.constant 0 : i32
    %c0_i32_0 = arith.constant 0 : i32
    %c0_i32_1 = arith.constant 0 : i32
    return %c0_i32, %c0_i32_0 : i32, i32
  }
  func.func @transform_1(%arg0: i32) -> (i32, i32) {
    %c0_i32 = arith.constant 0 : i32
    %c0_i32_0 = arith.constant 0 : i32
    return %c0_i32, %arg0 : i32, i32
  }
  func.func @transform_2(%arg0: i32) -> (i32, i32) {
    %c0_i32 = arith.constant 0 : i32
    %c0_i32_0 = arith.constant 0 : i32
    return %c0_i32, %arg0 : i32, i32
  }
  func.func @transform_3(%arg0: i32) -> (i32, i32, i32) {
    %c0_i32 = arith.constant 0 : i32
    %c0_i32_0 = arith.constant 0 : i32
    %c0_i32_1 = arith.constant 0 : i32
    return %arg0, %c0_i32, %c0_i32_0 : i32, i32, i32
  }
}

</mosaic_0001>

<bundles_post_ra>
// kernel: tpu_custom_call.1
= control target key start
LH: loop header
LB: loop body
LE: loop exit
PB: predicated region body
PF: predicated region fallthrough
CT: control target
= control target key end

     0   :  { %v170_v1 = vmov 0   ;;  %s234_s0 = inlined_call_operand.vmem [shape: f32[6,1], index: 0, kind: input, shape index: {}]   ;;  %s235_s1 = inlined_call_operand.vmem [shape: f32[6,32], index: 1, kind: input, shape index: {}]   ;;  %s236_s2 = inlined_call_operand.vmem [shape: s16[1,128], index: 2, kind: input, shape index: {}]   ;;  %s237_s3 = inlined_call_operand.hbm [shape: f32[1,8,128], index: 3, kind: output, shape index: {}]  }
   0x1   :  { %v64_v0 = vld [vmem:[%s234_s0] sm:$0x3f]  ;;  %139 = vset.pattern.permute.xlu0 %v170_v1 }
   0x2   :  { %8 = vsyncpa [#allocation3], 0  ;;  %67 = vperm.xlu0 %139, %v64_v0   ;;  %v16_v2 = vld [vmem:[%s236_s2] sm:$0x1]  ;;  %vm85_vm1 = vcmask 1040384   ;;  %v171_v5 = vmov 0.0   ;;  %v38_v18 = vlaneseq }
   0x3   :  { %v17_v3 = vunpack.c.l.b16 %v16_v2  ;;  %v15_v8 = vld [vmem:[%s235_s1] sm:$0x3f]  ;;  %vm18_vm2 = vcmask 1045504   ;;  %s172_s2 = smov [#allocation2]  }
   0x4   :  { %v19_v9 = vsel %vm18_vm2, %v15_v8, -inf  ;;  %v39_v19 = vshrl.u32 %v38_v18, 7  ;;  %v109_v4 = vand.u32 127, %v38_v18  ;;  %s123_s17 = sshll.u32 %s172_s2, 4  ;;  %s124_s17 = int_to_ptr.vmem [resolvable:$true] %s123_s17 }
   0x5   :  { %vm199_vm0 = vcmp.ne.s32.totalorder %v17_v3, 4294967196  ;;  %v20_v10 = vrot.slane %v19_v9, 4  ;;  %s146_s19 = scalar_lea.vmem %s124_s17, 128  ;;  %p151_p1 = scmp.lt.s32.totalorder %s124_s17, %s124_s17 }
   0x6   :  { %v131_v6 = vsel %vm199_vm0, 1.0, %v171_v5  ;;  %v42_v21 = vsub.s32 0, %v39_v19  ;;  %vm111_vm4 = vcmp.eq.s32.totalorder %v109_v4, 1  ;;  %vm110_vm5 = vcmp.eq.s32.totalorder %v109_v4, 0  ;;  %p147_p0 = scmp.ne.s32.totalorder %s124_s17, %s146_s19  ;;  %p152_p2 = scmp.lt.s32.totalorder %s146_s19, %s146_s19 }
   0x7   :  { %v98_v7 = vsel %vm85_vm1, %v131_v6, 0.0  ;;  %v21_v11 = vmax.f32 %v19_v9, %v20_v10 }
   0x8   :  { %99 = vadd.xlane.f32.xlu1 %v98_v7  ;;  %v43_v24 = vrot.slane %v17_v3, %v42_v21  ;;  %p153_p3 = por %p152_p2, %p151_p1 }
   0x9   :  { %v22_v12 = vrot.slane %v21_v11, 2 }
   0xa   :  { %vm44_vm3 = vcmp.eq.s32.totalorder %v39_v19, %v43_v24  ;;  %p154_p4 = pnand %p153_p3, %p147_p0 }
   0xb   :  { %v23_v13 = vmax.f32 %v21_v11, %v22_v12 }
   0xd   :  { %v24_v14 = vrot.slane %v23_v13, 1 }
   0xf   :  { %v25_v15 = vmax.f32 %v23_v13, %v24_v14 }
  0x11   :  { %v26_v16 = vsub.f32 %v15_v8, %v25_v15 }
  0x13   :  { %v27_v17 = vmul.f32 1.442695, %v26_v16  ;;  %v45_v32 = vsel %vm44_vm3, %v26_v16, 0.0 }
  0x14   :  { %v46_v34 = vsel %vm18_vm2, %v45_v32, 0.0 }
  0x15   :  { %140 = vpow2.f32 %v27_v17  ;;  %v47_v37 = vrot.slane %v46_v34, 4 }
  0x17   :  { %v48_v39 = vadd.f32 %v47_v37, %v46_v34 }
  0x19   :  { %v49_v41 = vrot.slane %v48_v39, 2 }
  0x1b   :  { %v50_v47 = vadd.f32 %v49_v41, %v48_v39 }
  0x1d   :  { %v51_v52 = vrot.slane %v50_v47, 1 }
  0x1f   :  { %v141_v20 = vpop.eup %140  ;;  %v52_v58 = vadd.f32 %v51_v52, %v50_v47 }
  0x20   :  { %v29_v22 = vsel %vm18_vm2, %v141_v20, 0.0  ;;  %v54_v26 = vsel %vm44_vm3, %v141_v20, 0.0 }
  0x21   :  { %v30_v23 = vrot.slane %v29_v22, 4  ;;  %v55_v28 = vsel %vm18_vm2, %v54_v26, 0.0 }
  0x22   :  { %v56_v30 = vrot.slane %v55_v28, 4 }
  0x23   :  { %v31_v25 = vadd.f32 %v30_v23, %v29_v22 }
  0x24   :  { %v57_v33 = vadd.f32 %v56_v30, %v55_v28 }
  0x25   :  { %v32_v27 = vrot.slane %v31_v25, 2 }
  0x26   :  { %v58_v36 = vrot.slane %v57_v33, 2 }
  0x27   :  { %v33_v29 = vadd.f32 %v32_v27, %v31_v25 }
  0x28   :  { %v59_v38 = vadd.f32 %v58_v36, %v57_v33 }
  0x29   :  { %v34_v31 = vrot.slane %v33_v29, 1 }
  0x2a   :  { %v60_v40 = vrot.slane %v59_v38, 1 }
  0x2b   :  { %v35_v35 = vadd.f32 %v34_v31, %v33_v29 }
  0x2c   :  { %v61_v44 = vadd.f32 %v60_v40, %v59_v38 }
  0x2d   :  { %142 = vrcp.f32 %v35_v35 }
  0x2e   :  { %144 = vlog2.f32 %v35_v35 }
  0x37   :  { %v143_v45 = vpop.eup %142 }
  0x38   :  { %v63_v50 = vmul.f32 %v143_v45, %v61_v44  ;;  %v145_v53 = vpop.eup %144 }
  0x39   :  { %v37_v57 = vmul.f32 0.6931472, %v145_v53 }
  0x3a   :  { %v78_v55 = vsub.f32 1.0, %v63_v50 }
  0x3b   :  { %v53_v62 = vsub.f32 %v52_v58, %v37_v57 }
  0x3c   :  { %v79_v60 = vmul.f32 %v78_v55, %v78_v55 }
  0x81   :  { %v68_v42 = vpop.permute.xlu0 %67 }
  0x82   :  { %v70_v43 = vsel %vm44_vm3, %v68_v42, 0.0 }
  0x83   :  { %v71_v46 = vsel %vm18_vm2, %v70_v43, 0.0 }
  0x84   :  { %v72_v48 = vrot.slane %v71_v46, 4 }
  0x86   :  { %v73_v49 = vadd.f32 %v72_v48, %v71_v46 }
  0x88   :  { %v74_v51 = vrot.slane %v73_v49, 2 }
  0x8a   :  { %v75_v54 = vadd.f32 %v74_v51, %v73_v49 }
  0x8c   :  { %v76_v56 = vrot.slane %v75_v54, 1 }
  0x8e   :  { %v77_v59 = vadd.f32 %v76_v56, %v75_v54 }
  0x90   :  { %v81_v61 = vsub.f32 0.0, %v77_v59 }
  0x92   :  { %v82_v63 = vmul.f32 %v81_v61, %v79_v60 }
  0x94   :  { %v83_v0 = vmul.f32 %v82_v63, %v53_v62 }
  0x95   :  { %v100_v3 = vpop.xlane.xlu1 %99 }
  0x96   :  { %v84_v1 = vsel %vm199_vm0, %v83_v0, 0.0  ;;  %v101_v5 = vrot.slane %v100_v3, 4 }
  0x97   :  { %v86_v2 = vsel %vm85_vm1, %v84_v1, 0.0 }
  0x98   :  { %87 = vadd.xlane.f32.xlu0 %v86_v2  ;;  %v102_v6 = vadd.f32 %v101_v5, %v100_v3 }
  0x9a   :  { %v103_v7 = vrot.slane %v102_v6, 2 }
  0x9c   :  { %v104_v11 = vadd.f32 %v103_v7, %v102_v6 }
  0x9e   :  { %v105_v14 = vrot.slane %v104_v11, 1 }
  0xa0   :  { %v106_v17 = vadd.f32 %v105_v14, %v104_v11 }
 0x125   :  { %v88_v8 = vpop.xlane.xlu0 %87 }
 0x126   :  { %v89_v9 = vrot.slane %v88_v8, 4 }
 0x128   :  { %v90_v10 = vadd.f32 %v89_v9, %v88_v8 }
 0x12a   :  { %v91_v12 = vrot.slane %v90_v10, 2 }
 0x12c   :  { %v92_v13 = vadd.f32 %v91_v12, %v90_v10 }
 0x12e   :  { %v93_v15 = vrot.slane %v92_v13, 1 }
 0x130   :  { %v94_v16 = vadd.f32 %v93_v15, %v92_v13 }
 0x132   :  { %132 = vpush %v94_v16 }
 0x133   :  { %134 = vpush %v106_v17 }
 0x163   :  { %s133_s1 = spop %132 }
 0x164   :  { %v114_v19 = vstv %s133_s1  ;;  %s135_s18 = spop %134 }
 0x165   :  { %v112_v20 = vstv %s135_s18 }
 0x166   :  { %v113_v21 = vsel %vm111_vm4, %v112_v20, 0.0 }
 0x167   :  { %v115_v22 = vsel %vm110_vm5, %v114_v19, %v113_v21 }
 0x168   :  { %116 = vst [vmem:[#allocation2] sm:$0xff] %v115_v22 }
 0x169   :  { %157 = shalt.err (!%p154_p4)
}
 0x16a   :  { %s158_s22 = scalar_lea.hbm %s237_s3, 128 }
 0x16b   :  { %p159_p5 = scmp.ne.s32.totalorder %s237_s3, %s158_s22  ;;  %p162_p6 = scmp.lt.u32.totalorder %s158_s22, %s237_s3 }
 0x16d   :  { %p164_p7 = pnand %p162_p6, %p159_p5 }
 0x16f   :  { %167 = shalt.err (!%p164_p7)
}
 0x170   :  { %126 = dma.vmem_to_hbm [thread:$0]  %s124_s17, 128, %s237_s3, [#allocation3]  }
 0x171   :  { %168 = dma.done.wait [#allocation3], 128  }
 0x172   :  { %169 = vsyncadd [#allocation3], 4294967168 }
 0x173   :  { %130 = vsyncpa [#allocation3], 1 }

</bundles_post_ra>
